<compile_context>
chip_gen: v6e
topology: v6e:2x2x1
jax: 0.10.0
libtpu: 0.0.40
codegen_flags: <defaults>
</compile_context>

<pallas_src>
import functools

import jax
import jax.numpy as jnp
from jax.experimental import pallas as pl
from jax.experimental.pallas import tpu as pltpu


def _round_up(n, m):
    return ((n + m - 1) // m) * m


def _tpu_generation():
    """Best-effort TPU generation string ('v5', 'v6', 'v7', ...) or None."""
    try:
        kind = jax.devices()[0].device_kind.lower()
    except Exception:
        return None
    for g in ("v7", "v6", "v5", "v4", "v3", "v2"):
        if g in kind:
            return g
    return None


def _vmem_limit_bytes():
    """Generation-aware scoped-VMEM request: leave headroom below physical capacity."""
    cap = None
    try:
        cap = getattr(pltpu.get_tpu_info(), "vmem_capacity_bytes", None)
    except Exception:
        cap = None
    if not cap:
        return 64 * 1024 * 1024  # conservative default
    # ~48 MiB on v7x (64 MiB physical), ~108 MiB on v5e/v6e (128 MiB physical).
    return int(max(32 * 1024 * 1024, min(cap - 16 * 1024 * 1024, int(cap * 0.85))))


def mlp_kernel(x_ref, w1_ref, b1_ref, w2_ref, b2_ref, w3_ref, b3_ref, o_ref, *, bf16_tanh):
    # Fused 3-layer MLP on one batch tile. Matmuls hit the MXU in bf16 with f32
    # accumulation; bias-add stays in f32. tanh runs on the EUP in bf16 on v6e/v7x
    # (bf16_tanh=True) or f32 on v5e.
    x = x_ref[...].astype(w1_ref.dtype)  # in-kernel bf16 cast: x streams from HBM as f32

    h1 = jnp.dot(x, w1_ref[...], preferred_element_type=jnp.float32) + b1_ref[...]
    if bf16_tanh:
        h1 = jnp.tanh(h1.astype(jnp.bfloat16))          # bf16 EUP tanh, feeds MXU directly
    else:
        h1 = jnp.tanh(h1).astype(w2_ref.dtype)          # f32 tanh (v5e), cast for MXU

    h2 = jnp.dot(h1, w2_ref[...], preferred_element_type=jnp.float32) + b2_ref[...]
    if bf16_tanh:
        h2 = jnp.tanh(h2.astype(jnp.bfloat16))
    else:
        h2 = jnp.tanh(h2).astype(w3_ref.dtype)

    out = jnp.dot(h2, w3_ref[...], preferred_element_type=jnp.float32) + b3_ref[...]
    o_ref[...] = out.astype(o_ref.dtype)


def mlp_forward(x, params, *, tile_b=512, compute_dtype=jnp.bfloat16):
    """x: (B, num_i) float32. params: dict of w1,b1,w2,b2,w3,b3 (weights pre-transposed,
    shapes (in, out) / (1, out)). Returns (B, num_o) in x.dtype."""
    w1, b1, w2, b2, w3, b3 = (params[k] for k in ("w1", "b1", "w2", "b2", "w3", "b3"))
    B, num_i = x.shape
    num_h = w1.shape[1]
    num_o = w3.shape[1]
    out_dtype = x.dtype

    gen = _tpu_generation()
    num_cores = 2 if gen == "v7" else 1          # v7x has 2 TensorCores per chip
    bf16_tanh = gen in ("v6", "v7")              # v5e has no bf16 EUP/VPU

    # --- Lane-dense hidden dim: zero-pad num_h to a multiple of 128 (exactly equivalent:
    #     padded h1/h2 columns are tanh(0)=0 and multiply zero weight rows downstream). ---
    num_h_p = _round_up(num_h, 128)
    if num_h_p != num_h:
        ph = num_h_p - num_h
        w1 = jnp.pad(w1, ((0, 0), (0, ph)))
        b1 = jnp.pad(b1, ((0, 0), (0, ph)))
        w2 = jnp.pad(w2, ((0, ph), (0, ph)))
        b2 = jnp.pad(b2, ((0, 0), (0, ph)))
        w3 = jnp.pad(w3, ((0, ph), (0, 0)))

    # --- Output columns: pad to 128 only when the head is wide enough to benefit from
    #     lane-dense stores; tiny heads keep the un-padded masked-store path. ---
    if num_o % 128 == 0 or num_o <= 64:
        num_o_p = num_o
    else:
        num_o_p = _round_up(num_o, 128)
        w3 = jnp.pad(w3, ((0, 0), (0, num_o_p - num_o)))
        b3 = jnp.pad(b3, ((0, 0), (0, num_o_p - num_o)))

    # --- bf16 weights for the MXU; biases stay f32 for the f32 epilogue. x stays f32
    #     (the bf16 cast happens in-kernel, saving a wrapper HBM pass). ---
    w1 = w1.astype(compute_dtype)
    w2 = w2.astype(compute_dtype)
    w3 = w3.astype(compute_dtype)
    b1 = b1.astype(jnp.float32)
    b2 = b2.astype(jnp.float32)
    b3 = b3.astype(jnp.float32)

    # --- Batch tile selection: multiple of 16 (bf16 sublane packing). ---
    if gen == "v5":
        tile_b = min(tile_b, 256)  # v5e: single vst slot + f32 epilogue -> avoid spills
    tb = max(16, min(_round_up(tile_b, 16), _round_up(B, 16)))
    # Keep the f32 intermediates (h1 + h2: tb * num_h_p * 4B each) within ~8 MiB.
    interm_rows = max(16, ((8 * 1024 * 1024) // (num_h_p * 4 * 2)) // 16 * 16)
    tb = min(tb, interm_rows)
    # v7x megacore: keep >= 2 parallel grid steps when the batch allows.
    B16 = _round_up(B, 16)
    if num_cores >= 2 and B16 >= 32:
        tb = min(tb, _round_up(-(-B16 // 2), 16))
    B_p = _round_up(B, tb)
    x_in = jnp.pad(x, ((0, B_p - B), (0, 0))) if B_p != B else x
    grid = (B_p // tb,)

    kernel = functools.partial(mlp_kernel, bf16_tanh=bf16_tanh)

    # TODO(synk): for very large num_h (w2 ~ num_h^2*2B no longer VMEM-resident, esp. on
    # v7x's 64 MiB), add a hidden-dim reduction grid axis with an f32 VMEM accumulator
    # instead of keeping w2/w3 fully resident.
    def _run(weight_mode):
        def const_spec(shape):
            return pl.BlockSpec(shape, lambda i: (0, 0), pipeline_mode=weight_mode)

        x_spec = pl.BlockSpec((tb, num_i), lambda i: (i, 0))
        o_spec = pl.BlockSpec((tb, num_o_p), lambda i: (i, 0))
        return pl.pallas_call(
            kernel,
            out_shape=jax.ShapeDtypeStruct((B_p, num_o_p), out_dtype),
            grid_spec=pltpu.PrefetchScalarGridSpec(
                num_scalar_prefetch=0,
                grid=grid,
                in_specs=[x_spec,
                          const_spec((num_i, num_h_p)), const_spec((1, num_h_p)),
                          const_spec((num_h_p, num_h_p)), const_spec((1, num_h_p)),
                          const_spec((num_h_p, num_o_p)), const_spec((1, num_o_p))],
                out_specs=o_spec,
            ),
            compiler_params=pltpu.CompilerParams(
                dimension_semantics=("parallel",),      # megacore-shardable batch axis
                vmem_limit_bytes=_vmem_limit_bytes(),   # generation-aware
            ),
        )(x_in, w1, b1, w2, b2, w3, b3)

    try:
        # Weights/biases have a constant index_map -> fetched once; single-buffer them.
        out_p = _run(pl.Buffered(1))
    except Exception:
        # Fallback: default (double-buffered) constant blocks.
        out_p = _run(None)

    return out_p[:B, :num_o]


def init_params(key, num_i, num_h, num_o):
    """Deterministic synthetic init mirroring torch.nn.Linear parameter shapes.
    torch stores Linear weight as (out, in); we store the transpose (in, out)."""
    ks = jax.random.split(key, 6)

    def uniform(k, shape, fan_in):
        bound = 1.0 / jnp.sqrt(fan_in)
        return jax.random.uniform(k, shape, jnp.float32, -bound, bound)

    return {
        "w1": uniform(ks[0], (num_i, num_h), num_i),
        "b1": uniform(ks[1], (1, num_h), num_i),
        "w2": uniform(ks[2], (num_h, num_h), num_h),
        "b2": uniform(ks[3], (1, num_h), num_h),
        "w3": uniform(ks[4], (num_h, num_o), num_h),
        "b3": uniform(ks[5], (1, num_o), num_h),
    }


def mlp_reference(x, p, *, bf16_tanh, compute_dtype=jnp.bfloat16):
    """Pure-JAX reference mirroring the kernel's cast points (bf16 MXU operands,
    f32 accumulation/bias, bf16 or f32 tanh)."""
    f32 = jnp.float32
    q = lambda a: a.astype(compute_dtype).astype(f32)

    def act(h):
        if bf16_tanh:
            return jnp.tanh(h.astype(compute_dtype)).astype(f32)
        return q(jnp.tanh(h))

    h1 = act(q(x) @ q(p["w1"]) + p["b1"].astype(f32))
    h2 = act(h1 @ q(p["w2"]) + p["b2"].astype(f32))
    return h2 @ q(p["w3"]) + p["b3"].astype(f32)


if __name__ == "__main__":
    B, num_i, num_h, num_o = 16, 32, 32, 16

    key = jax.random.PRNGKey(0)
    kx, kp = jax.random.split(key)
    x = jax.random.normal(kx, (B, num_i), jnp.float32)
    params = init_params(kp, num_i, num_h, num_o)

    bf16_tanh = _tpu_generation() in ("v6", "v7")
    tol = 2e-2 if bf16_tanh else 2e-3  # bf16 tanh / bf16 matmul error at K<=128

    out = jax.block_until_ready(mlp_forward(x, params))
    ref = mlp_reference(x, params, bf16_tanh=bf16_tanh)
    assert out.shape == (B, num_o)
    assert jnp.allclose(out, ref, atol=tol, rtol=tol), "mismatch vs JAX reference"

    # Also exercise the non-divisible-batch (padding) path.
    x_odd = jax.random.normal(kx, (13, num_i), jnp.float32)
    out_odd = jax.block_until_ready(mlp_forward(x_odd, params))
    ref_odd = mlp_reference(x_odd, params, bf16_tanh=bf16_tanh)
    assert out_odd.shape == (13, num_o)
    assert jnp.allclose(out_odd, ref_odd, atol=tol, rtol=tol), "mismatch (ragged batch)"

    print("KERNEL_OK")
</pallas_src>

<mosaic_0001>
module attributes {stable_mosaic.version = 11 : i64} {
  func.func @mlp_kernel(%arg0: i32, %arg1: memref<16x32xf32, #tpu.memory_space<vmem>>, %arg2: memref<32x128xbf16, #tpu.memory_space<vmem>>, %arg3: memref<1x128xf32, #tpu.memory_space<vmem>>, %arg4: memref<128x128xbf16, #tpu.memory_space<vmem>>, %arg5: memref<1x128xf32, #tpu.memory_space<vmem>>, %arg6: memref<128x16xbf16, #tpu.memory_space<vmem>>, %arg7: memref<1x16xf32, #tpu.memory_space<vmem>>, %arg8: memref<16x16xf32, #tpu.memory_space<vmem>>) attributes {dimension_semantics = [#tpu.dimension_semantics<parallel>], iteration_bounds = array<i64: 1>, scalar_prefetch = 0 : i64, scratch_operands = 0 : i64, tpu.core_type = #tpu.core_type<tc>, window_params = [{transform_indices = @transform_0, window_bounds = array<i64: 16, 32>}, {pipeline_mode = #tpu.pipeline_mode<synchronous>, transform_indices = @transform_1, window_bounds = array<i64: 32, 128>}, {pipeline_mode = #tpu.pipeline_mode<synchronous>, transform_indices = @transform_2, window_bounds = array<i64: 1, 128>}, {pipeline_mode = #tpu.pipeline_mode<synchronous>, transform_indices = @transform_3, window_bounds = array<i64: 128, 128>}, {pipeline_mode = #tpu.pipeline_mode<synchronous>, transform_indices = @transform_4, window_bounds = array<i64: 1, 128>}, {pipeline_mode = #tpu.pipeline_mode<synchronous>, transform_indices = @transform_5, window_bounds = array<i64: 128, 16>}, {pipeline_mode = #tpu.pipeline_mode<synchronous>, transform_indices = @transform_6, window_bounds = array<i64: 1, 16>}, {transform_indices = @transform_7, window_bounds = array<i64: 16, 16>}]} {
    %c0 = arith.constant 0 : index
    %c0_0 = arith.constant 0 : index
    %0 = vector.load %arg1[%c0, %c0_0] : memref<16x32xf32, #tpu.memory_space<vmem>>, vector<16x32xf32>
    %1 = arith.truncf %0 : vector<16x32xf32> to vector<16x32xbf16>
    %c0_1 = arith.constant 0 : index
    %c0_2 = arith.constant 0 : index
    %2 = vector.load %arg2[%c0_1, %c0_2] : memref<32x128xbf16, #tpu.memory_space<vmem>>, vector<32x128xbf16>
    %cst = arith.constant dense<0.000000e+00> : vector<16x128xf32>
    %3 = tpu.matmul %1, %2, %cst {dimension_numbers = #tpu.dot_dimension_numbers<[1], [0], [0], [1], [0, 0, 1, 1], [], []>} : vector<16x32xbf16>, vector<32x128xbf16>, vector<16x128xf32> -> vector<16x128xf32>
    %c0_3 = arith.constant 0 : index
    %c0_4 = arith.constant 0 : index
    %4 = vector.load %arg3[%c0_3, %c0_4] : memref<1x128xf32, #tpu.memory_space<vmem>>, vector<1x128xf32>
    %5 = vector.broadcast %4 : vector<1x128xf32> to vector<16x128xf32>
    %6 = arith.addf %3, %5 : vector<16x128xf32>
    %7 = math.tanh %6 : vector<16x128xf32>
    %8 = arith.truncf %7 : vector<16x128xf32> to vector<16x128xbf16>
    %c0_5 = arith.constant 0 : index
    %c0_6 = arith.constant 0 : index
    %9 = vector.load %arg4[%c0_5, %c0_6] : memref<128x128xbf16, #tpu.memory_space<vmem>>, vector<128x128xbf16>
    %cst_7 = arith.constant dense<0.000000e+00> : vector<16x128xf32>
    %10 = tpu.matmul %8, %9, %cst_7 {dimension_numbers = #tpu.dot_dimension_numbers<[1], [0], [0], [1], [0, 0, 1, 1], [], []>} : vector<16x128xbf16>, vector<128x128xbf16>, vector<16x128xf32> -> vector<16x128xf32>
    %c0_8 = arith.constant 0 : index
    %c0_9 = arith.constant 0 : index
    %11 = vector.load %arg5[%c0_8, %c0_9] : memref<1x128xf32, #tpu.memory_space<vmem>>, vector<1x128xf32>
    %12 = vector.broadcast %11 : vector<1x128xf32> to vector<16x128xf32>
    %13 = arith.addf %10, %12 : vector<16x128xf32>
    %14 = math.tanh %13 : vector<16x128xf32>
    %15 = arith.truncf %14 : vector<16x128xf32> to vector<16x128xbf16>
    %c0_10 = arith.constant 0 : index
    %c0_11 = arith.constant 0 : index
    %16 = vector.load %arg6[%c0_10, %c0_11] : memref<128x16xbf16, #tpu.memory_space<vmem>>, vector<128x16xbf16>
    %cst_12 = arith.constant dense<0.000000e+00> : vector<16x16xf32>
    %17 = tpu.matmul %15, %16, %cst_12 {dimension_numbers = #tpu.dot_dimension_numbers<[1], [0], [0], [1], [0, 0, 1, 1], [], []>} : vector<16x128xbf16>, vector<128x16xbf16>, vector<16x16xf32> -> vector<16x16xf32>
    %c0_13 = arith.constant 0 : index
    %c0_14 = arith.constant 0 : index
    %18 = vector.load %arg7[%c0_13, %c0_14] : memref<1x16xf32, #tpu.memory_space<vmem>>, vector<1x16xf32>
    %19 = vector.broadcast %18 : vector<1x16xf32> to vector<16x16xf32>
    %20 = arith.addf %17, %19 : vector<16x16xf32>
    %c0_15 = arith.constant 0 : index
    %c0_16 = arith.constant 0 : index
    %21 = vector.load %arg8[%c0_15, %c0_16] : memref<16x16xf32, #tpu.memory_space<vmem>>, vector<16x16xf32>
    tpu.vector_store %arg8[%c0_15, %c0_16], %20 {strides = array<i32>} : memref<16x16xf32, #tpu.memory_space<vmem>>, vector<16x16xf32>,
    return
  }
  func.func @transform_0(%arg0: i32) -> (i32, i32) {
    %c0_i32 = arith.constant 0 : i32
    %c0_i32_0 = arith.constant 0 : i32
    return %arg0, %c0_i32 : i32, i32
  }
  func.func @transform_1(%arg0: i32) -> (i32, i32) {
    %c0_i32 = arith.constant 0 : i32
    %c0_i32_0 = arith.constant 0 : i32
    %c0_i32_1 = arith.constant 0 : i32
    return %c0_i32, %c0_i32_0 : i32, i32
  }
  func.func @transform_2(%arg0: i32) -> (i32, i32) {
    %c0_i32 = arith.constant 0 : i32
    %c0_i32_0 = arith.constant 0 : i32
    %c0_i32_1 = arith.constant 0 : i32
    return %c0_i32, %c0_i32_0 : i32, i32
  }
  func.func @transform_3(%arg0: i32) -> (i32, i32) {
    %c0_i32 = arith.constant 0 : i32
    %c0_i32_0 = arith.constant 0 : i32
    %c0_i32_1 = arith.constant 0 : i32
    return %c0_i32, %c0_i32_0 : i32, i32
  }
  func.func @transform_4(%arg0: i32) -> (i32, i32) {
    %c0_i32 = arith.constant 0 : i32
    %c0_i32_0 = arith.constant 0 : i32
    %c0_i32_1 = arith.constant 0 : i32
    return %c0_i32, %c0_i32_0 : i32, i32
  }
  func.func @transform_5(%arg0: i32) -> (i32, i32) {
    %c0_i32 = arith.constant 0 : i32
    %c0_i32_0 = arith.constant 0 : i32
    %c0_i32_1 = arith.constant 0 : i32
    return %c0_i32, %c0_i32_0 : i32, i32
  }
  func.func @transform_6(%arg0: i32) -> (i32, i32) {
    %c0_i32 = arith.constant 0 : i32
    %c0_i32_0 = arith.constant 0 : i32
    %c0_i32_1 = arith.constant 0 : i32
    return %c0_i32, %c0_i32_0 : i32, i32
  }
  func.func @transform_7(%arg0: i32) -> (i32, i32) {
    %c0_i32 = arith.constant 0 : i32
    %c0_i32_0 = arith.constant 0 : i32
    return %arg0, %c0_i32 : i32, i32
  }
}

module attributes {stable_mosaic.version = 11 : i64} {
  func.func @mlp_kernel(%arg0: i32, %arg1: memref<16x32xf32, #tpu.memory_space<vmem>>, %arg2: memref<32x128xbf16, #tpu.memory_space<vmem>>, %arg3: memref<1x128xf32, #tpu.memory_space<vmem>>, %arg4: memref<128x128xbf16, #tpu.memory_space<vmem>>, %arg5: memref<1x128xf32, #tpu.memory_space<vmem>>, %arg6: memref<128x16xbf16, #tpu.memory_space<vmem>>, %arg7: memref<1x16xf32, #tpu.memory_space<vmem>>, %arg8: memref<16x16xf32, #tpu.memory_space<vmem>>) attributes {dimension_semantics = [#tpu.dimension_semantics<parallel>], iteration_bounds = array<i64: 1>, scalar_prefetch = 0 : i64, scratch_operands = 0 : i64, tpu.core_type = #tpu.core_type<tc>, window_params = [{transform_indices = @transform_0, window_bounds = array<i64: 16, 32>}, {pipeline_mode = #tpu.pipeline_mode<synchronous>, transform_indices = @transform_1, window_bounds = array<i64: 32, 128>}, {pipeline_mode = #tpu.pipeline_mode<synchronous>, transform_indices = @transform_2, window_bounds = array<i64: 1, 128>}, {pipeline_mode = #tpu.pipeline_mode<synchronous>, transform_indices = @transform_3, window_bounds = array<i64: 128, 128>}, {pipeline_mode = #tpu.pipeline_mode<synchronous>, transform_indices = @transform_4, window_bounds = array<i64: 1, 128>}, {pipeline_mode = #tpu.pipeline_mode<synchronous>, transform_indices = @transform_5, window_bounds = array<i64: 128, 16>}, {pipeline_mode = #tpu.pipeline_mode<synchronous>, transform_indices = @transform_6, window_bounds = array<i64: 1, 16>}, {transform_indices = @transform_7, window_bounds = array<i64: 16, 16>}]} {
    %c0 = arith.constant 0 : index
    %c0_0 = arith.constant 0 : index
    %0 = vector.load %arg1[%c0, %c0_0] : memref<16x32xf32, #tpu.memory_space<vmem>>, vector<16x32xf32>
    %1 = arith.truncf %0 : vector<16x32xf32> to vector<16x32xbf16>
    %c0_1 = arith.constant 0 : index
    %c0_2 = arith.constant 0 : index
    %2 = vector.load %arg2[%c0_1, %c0_2] : memref<32x128xbf16, #tpu.memory_space<vmem>>, vector<32x128xbf16>
    %cst = arith.constant dense<0.000000e+00> : vector<16x128xf32>
    %3 = tpu.matmul %1, %2, %cst {dimension_numbers = #tpu.dot_dimension_numbers<[1], [0], [0], [1], [0, 0, 1, 1], [], []>} : vector<16x32xbf16>, vector<32x128xbf16>, vector<16x128xf32> -> vector<16x128xf32>
    %c0_3 = arith.constant 0 : index
    %c0_4 = arith.constant 0 : index
    %4 = vector.load %arg3[%c0_3, %c0_4] : memref<1x128xf32, #tpu.memory_space<vmem>>, vector<1x128xf32>
    %5 = vector.broadcast %4 : vector<1x128xf32> to vector<16x128xf32>
    %6 = arith.addf %3, %5 : vector<16x128xf32>
    %7 = math.tanh %6 : vector<16x128xf32>
    %8 = arith.truncf %7 : vector<16x128xf32> to vector<16x128xbf16>
    %c0_5 = arith.constant 0 : index
    %c0_6 = arith.constant 0 : index
    %9 = vector.load %arg4[%c0_5, %c0_6] : memref<128x128xbf16, #tpu.memory_space<vmem>>, vector<128x128xbf16>
    %cst_7 = arith.constant dense<0.000000e+00> : vector<16x128xf32>
    %10 = tpu.matmul %8, %9, %cst_7 {dimension_numbers = #tpu.dot_dimension_numbers<[1], [0], [0], [1], [0, 0, 1, 1], [], []>} : vector<16x128xbf16>, vector<128x128xbf16>, vector<16x128xf32> -> vector<16x128xf32>
    %c0_8 = arith.constant 0 : index
    %c0_9 = arith.constant 0 : index
    %11 = vector.load %arg5[%c0_8, %c0_9] : memref<1x128xf32, #tpu.memory_space<vmem>>, vector<1x128xf32>
    %12 = vector.broadcast %11 : vector<1x128xf32> to vector<16x128xf32>
    %13 = arith.addf %10, %12 : vector<16x128xf32>
    %14 = math.tanh %13 : vector<16x128xf32>
    %15 = arith.truncf %14 : vector<16x128xf32> to vector<16x128xbf16>
    %c0_10 = arith.constant 0 : index
    %c0_11 = arith.constant 0 : index
    %16 = vector.load %arg6[%c0_10, %c0_11] : memref<128x16xbf16, #tpu.memory_space<vmem>>, vector<128x16xbf16>
    %cst_12 = arith.constant dense<0.000000e+00> : vector<16x16xf32>
    %17 = tpu.matmul %15, %16, %cst_12 {dimension_numbers = #tpu.dot_dimension_numbers<[1], [0], [0], [1], [0, 0, 1, 1], [], []>} : vector<16x128xbf16>, vector<128x16xbf16>, vector<16x16xf32> -> vector<16x16xf32>
    %c0_13 = arith.constant 0 : index
    %c0_14 = arith.constant 0 : index
    %18 = vector.load %arg7[%c0_13, %c0_14] : memref<1x16xf32, #tpu.memory_space<vmem>>, vector<1x16xf32>
    %19 = vector.broadcast %18 : vector<1x16xf32> to vector<16x16xf32>
    %20 = arith.addf %17, %19 : vector<16x16xf32>
    %c0_15 = arith.constant 0 : index
    %c0_16 = arith.constant 0 : index
    %21 = vector.load %arg8[%c0_15, %c0_16] : memref<16x16xf32, #tpu.memory_space<vmem>>, vector<16x16xf32>
    tpu.vector_store %arg8[%c0_15, %c0_16], %20 {strides = array<i32>} : memref<16x16xf32, #tpu.memory_space<vmem>>, vector<16x16xf32>,
    return
  }
  func.func @transform_0(%arg0: i32) -> (i32, i32) {
    %c0_i32 = arith.constant 0 : i32
    %c0_i32_0 = arith.constant 0 : i32
    return %arg0, %c0_i32 : i32, i32
  }
  func.func @transform_1(%arg0: i32) -> (i32, i32) {
    %c0_i32 = arith.constant 0 : i32
    %c0_i32_0 = arith.constant 0 : i32
    %c0_i32_1 = arith.constant 0 : i32
    return %c0_i32, %c0_i32_0 : i32, i32
  }
  func.func @transform_2(%arg0: i32) -> (i32, i32) {
    %c0_i32 = arith.constant 0 : i32
    %c0_i32_0 = arith.constant 0 : i32
    %c0_i32_1 = arith.constant 0 : i32
    return %c0_i32, %c0_i32_0 : i32, i32
  }
  func.func @transform_3(%arg0: i32) -> (i32, i32) {
    %c0_i32 = arith.constant 0 : i32
    %c0_i32_0 = arith.constant 0 : i32
    %c0_i32_1 = arith.constant 0 : i32
    return %c0_i32, %c0_i32_0 : i32, i32
  }
  func.func @transform_4(%arg0: i32) -> (i32, i32) {
    %c0_i32 = arith.constant 0 : i32
    %c0_i32_0 = arith.constant 0 : i32
    %c0_i32_1 = arith.constant 0 : i32
    return %c0_i32, %c0_i32_0 : i32, i32
  }
  func.func @transform_5(%arg0: i32) -> (i32, i32) {
    %c0_i32 = arith.constant 0 : i32
    %c0_i32_0 = arith.constant 0 : i32
    %c0_i32_1 = arith.constant 0 : i32
    return %c0_i32, %c0_i32_0 : i32, i32
  }
  func.func @transform_6(%arg0: i32) -> (i32, i32) {
    %c0_i32 = arith.constant 0 : i32
    %c0_i32_0 = arith.constant 0 : i32
    %c0_i32_1 = arith.constant 0 : i32
    return %c0_i32, %c0_i32_0 : i32, i32
  }
  func.func @transform_7(%arg0: i32) -> (i32, i32) {
    %c0_i32 = arith.constant 0 : i32
    %c0_i32_0 = arith.constant 0 : i32
    return %arg0, %c0_i32 : i32, i32
  }
}

</mosaic_0001>

<bundles_post_ra>
// kernel: tpu_custom_call.1
= control target key start
LH: loop header
LB: loop body
LE: loop exit
PB: predicated region body
PF: predicated region fallthrough
CT: control target
= control target key end

     0   :  { %12 = vsyncpa [#allocation3], 0  ;;  %s715_s0 = inlined_call_operand.hbm [shape: f32[16,32], index: 0, kind: input, shape index: {}]   ;;  %s716_s1 = inlined_call_operand.hbm [shape: bf16[32,128], index: 1, kind: input, shape index: {}]   ;;  %s717_s2 = inlined_call_operand.vmem [shape: f32[1,128], index: 2, kind: input, shape index: {}]   ;;  %s718_s3 = inlined_call_operand.vmem [shape: bf16[128,128], index: 3, kind: input, shape index: {}]   ;;  %s719_s4 = inlined_call_operand.vmem [shape: f32[1,128], index: 4, kind: input, shape index: {}]   ;;  %s720_s5 = inlined_call_operand.vmem [shape: bf16[128,16], index: 5, kind: input, shape index: {}]   ;;  %s721_s6 = inlined_call_operand.vmem [shape: f32[1,16], index: 6, kind: input, shape index: {}]   ;;  %s722_s7 = inlined_call_operand.hbm [shape: f32[16,16], index: 7, kind: output, shape index: {}]  }
   0x1   :  { %13 = vsyncpa [#allocation6], 0 }
   0x2   :  { %14 = vsyncpa [#allocation4], 0  ;;  %s570_s24 = smov [#allocation2]  }
   0x3   :  { %s20_s25 = sshll.u32 %s570_s24, 4  ;;  %s21_s25 = int_to_ptr.vmem [resolvable:$true] %s20_s25 }
   0x4   :  { %s512_s26 = scalar_lea.vmem %s21_s25, 256  ;;  %p517_p1 = scmp.lt.s32.totalorder %s21_s25, %s21_s25 }
   0x5   :  { %p513_p0 = scmp.ne.s32.totalorder %s21_s25, %s512_s26  ;;  %p518_p2 = scmp.lt.s32.totalorder %s512_s26, %s512_s26 }
   0x7   :  { %p519_p3 = por %p518_p2, %p517_p1 }
   0x9   :  { %p520_p4 = pnand %p519_p3, %p513_p0 }
   0xb   :  { %523 = shalt.err (!%p520_p4)
}
   0xc   :  { %s571_s27 = smov 128   ;;  %s572_s28 = smov 8  }
   0xd   :  { %26 = dma.hbm_to_vmem [thread:$0]  %s715_s0, 256, %s21_s25, [#allocation3], %s571_s27, %s571_s27, %s572_s28  }
   0xe   :  { %s573_s8 = smov [#allocation5]  }
   0xf   :  { %s32_s9 = sshll.u32 %s573_s8, 4  ;;  %s33_s9 = int_to_ptr.vmem [resolvable:$true] %s32_s9 }
  0x10   :  { %s532_s10 = scalar_lea.vmem %s33_s9, 256  ;;  %p537_p6 = scmp.lt.s32.totalorder %s33_s9, %s33_s9 }
  0x11   :  { %p533_p5 = scmp.ne.s32.totalorder %s33_s9, %s532_s10  ;;  %p538_p7 = scmp.lt.s32.totalorder %s532_s10, %s532_s10 }
  0x13   :  { %p539_p8 = por %p538_p7, %p537_p6 }
  0x15   :  { %p540_p9 = pnand %p539_p8, %p533_p5 }
  0x17   :  { %543 = shalt.err (!%p540_p9)
}
  0x18   :  { %s574_s11 = smov 64   ;;  %s575_s12 = smov 4  }
  0x19   :  { %38 = dma.hbm_to_vmem [thread:$0]  %s716_s1, 256, %s33_s9, [#allocation6], %s574_s11, %s574_s11, %s575_s12  }
  0x1a   :  { %564 = dma.done.wait [#allocation3], 256  }
  0x1b   :  { %565 = vsyncadd [#allocation3], 4294967040 }
  0x1c   :  { %566 = dma.done.wait [#allocation6], 256  }
  0x1d   :  { %567 = vsyncadd [#allocation6], 4294967040  ;;  %v576_v0 = vmov 0.0   ;;  %vm577_vm0 = vmmov 0   ;;  %v478_v1 = vld [vmem:[#allocation5 + $0x8] sm:$0xff]   ;;  %v479_v2 = vld [vmem:[#allocation5] sm:$0xff]  }
  0x1e   :  { %421 = vmatprep.subr.bf16.mxu0 %v576_v0  ;;  %425 = vmatprep.mubr.msk.bf16.mxu0 %vm577_vm0, %v576_v0  ;;  %v56_v3 = vld [vmem:[#allocation2] sm:$0xff]  ;;  %v57_v4 = vld [vmem:[#allocation2 + $0x8] sm:$0xff]  ;;  %v480_v5 = vld [vmem:[%s718_s3 + $0x38] sm:$0xff]   ;;  %vm82_vm1 = vcmask 261120   ;;  %vm357_vm2 = vcmask 130048  }
  0x1f   :  { %429 = vmatprep.subr.bf16.mxu1 %v576_v0  ;;  %445 = vmatprep.mubr.msk.bf16.mxu1 %vm577_vm0, %v576_v0  ;;  %v481_v6 = vld [vmem:[%s718_s3 + $0x30] sm:$0xff]   ;;  %v58_v7 = vpack.c.bf16 %v57_v4, %v56_v3  ;;  %v482_v8 = vld [vmem:[%s718_s3 + $0x28] sm:$0xff]   ;;  %v483_v9 = vld [vmem:[%s718_s3 + $0x20] sm:$0xff]  }
  0x20   :  { %422 = vmatpush3.bf16.msra.mxu0 %v478_v1  ;;  %430 = vmatpush3.bf16.msra.mxu1 %v480_v5  ;;  %v484_v10 = vld [vmem:[%s718_s3 + $0x18] sm:$0xff]   ;;  %v485_v11 = vld [vmem:[%s718_s3 + $0x10] sm:$0xff]   ;;  %v486_v12 = vld [vmem:[%s718_s3 + $0x8] sm:$0xff]  }
  0x21   :  { %423 = vmatprep.subr.bf16.mxu0 %v576_v0  ;;  %431 = vmatprep.subr.bf16.mxu1 %v576_v0  ;;  %v487_v13 = vld [vmem:[%s718_s3] sm:$0xff]   ;;  %v488_v14 = vld [vmem:[%s720_s5 + $0x38] sm:$0xff]   ;;  %v489_v15 = vld [vmem:[%s720_s5 + $0x30] sm:$0xff]  }
  0x22   :  { %v378_v16 = vld [vmem:[%s717_s2] ss:$0 sm:$0xff]  ;;  %v490_v26 = vld [vmem:[%s720_s5 + $0x28] sm:$0xff]   ;;  %v492_v28 = vld [vmem:[%s720_s5 + $0x18] sm:$0xff]  }
  0x23   :  { %v491_v27 = vld [vmem:[%s720_s5 + $0x20] sm:$0xff]   ;;  %v493_v29 = vld [vmem:[%s720_s5 + $0x10] sm:$0xff]   ;;  %v494_v30 = vld [vmem:[%s720_s5 + $0x8] sm:$0xff]  }
  0x24   :  { %424 = vmatpush3.bf16.msra.mxu0 %v479_v2  ;;  %432 = vmatpush3.bf16.msra.mxu1 %v481_v6  ;;  %v495_v31 = vld [vmem:[%s720_s5] sm:$0xff]  }
  0x25   :  { %449 = vmatprep.subr.bf16.mxu0 %v576_v0  ;;  %433 = vmatprep.subr.bf16.mxu1 %v576_v0  ;;  %v382_v32 = vld [vmem:[%s719_s4] ss:$0 sm:$0xff]  ;;  %s578_s4 = smov [#allocation7]  }
  0x26   :  { %v391_v42 = vld [vmem:[%s721_s6] ss:$0 sm:$0xff]  ;;  %s365_s25 = sshll.u32 %s578_s4, 4  ;;  %s366_s25 = int_to_ptr.vmem [resolvable:$true] %s365_s25 }
  0x27   :  { %426 = vmatmul.mubr.msk.bf16.vlgmr.msra.gmra.mxu0 %vm82_vm1, %v58_v7  ;;  %s544_s26 = scalar_lea.vmem %s366_s25, 256  ;;  %p549_p11 = scmp.lt.s32.totalorder %s366_s25, %s366_s25 }
  0x28   :  { %465 = vmatprep.mubr.msk.bf16.mxu0 %vm577_vm0, %v576_v0  ;;  %434 = vmatpush3.bf16.msra.mxu1 %v482_v8  ;;  %p545_p10 = scmp.ne.s32.totalorder %s366_s25, %s544_s26  ;;  %p550_p12 = scmp.lt.s32.totalorder %s544_s26, %s544_s26 }
  0x29   :  { %435 = vmatprep.subr.bf16.mxu1 %v576_v0  ;;  %450 = vmatpush3.bf16.msra.mxu0 %v488_v14 }
  0x2a   :  { %451 = vmatprep.subr.bf16.mxu0 %v576_v0  ;;  %p551_p13 = por %p550_p12, %p549_p11 }
  0x2c   :  { %436 = vmatpush3.bf16.msra.mxu1 %v483_v9  ;;  %p552_p0 = pnand %p551_p13, %p545_p10 }
  0x2d   :  { %437 = vmatprep.subr.bf16.mxu1 %v576_v0  ;;  %452 = vmatpush3.bf16.msra.mxu0 %v489_v15 }
  0x2e   :  { %453 = vmatprep.subr.bf16.mxu0 %v576_v0 }
  0x30   :  { %438 = vmatpush3.bf16.msra.mxu1 %v484_v10 }
  0x31   :  { %439 = vmatprep.subr.bf16.mxu1 %v576_v0  ;;  %454 = vmatpush3.bf16.msra.mxu0 %v490_v26 }
  0x32   :  { %455 = vmatprep.subr.bf16.mxu0 %v576_v0 }
  0x34   :  { %440 = vmatpush3.bf16.msra.mxu1 %v485_v11 }
  0x35   :  { %441 = vmatprep.subr.bf16.mxu1 %v576_v0  ;;  %456 = vmatpush3.bf16.msra.mxu0 %v491_v27 }
  0x36   :  { %457 = vmatprep.subr.bf16.mxu0 %v576_v0 }
  0x38   :  { %442 = vmatpush3.bf16.msra.mxu1 %v486_v12 }
  0x39   :  { %443 = vmatprep.subr.bf16.mxu1 %v576_v0  ;;  %458 = vmatpush3.bf16.msra.mxu0 %v492_v28 }
  0x3a   :  { %459 = vmatprep.subr.bf16.mxu0 %v576_v0 }
  0x3c   :  { %444 = vmatpush3.bf16.msra.mxu1 %v487_v13 }
  0x3d   :  { %460 = vmatpush3.bf16.msra.mxu0 %v493_v29 }
  0x3e   :  { %461 = vmatprep.subr.bf16.mxu0 %v576_v0 }
  0x41   :  { %462 = vmatpush3.bf16.msra.mxu0 %v494_v30 }
  0x42   :  { %463 = vmatprep.subr.bf16.mxu0 %v576_v0 }
  0x45   :  { %464 = vmatpush3.bf16.msra.mxu0 %v495_v31 }
  0xe7   :  { %v120_v17 = vpop.f32.mrf.mxu0 }
  0xe8   :  { %v121_v18 = vadd.f32 %v378_v16, %v120_v17 }
  0xe9   :  { %v427_v19 = vpop.f32.mrf.mxu0 }
  0xea   :  { %496 = vtanh.f32 %v121_v18 }
  0xeb   :  { %v123_v20 = vpop.f32.mrf.mxu0 }
  0xec   :  { %v124_v21 = vadd.f32 %v378_v16, %v123_v20 }
  0xed   :  { %v428_v22 = vpop.f32.mrf.mxu0 }
  0xee   :  { %498 = vtanh.f32 %v124_v21 }
  0xf7   :  { %v497_v23 = vpop.eup %496 }
  0xfb   :  { %v499_v24 = vpop.eup %498 }
  0xfc   :  { %v129_v25 = vpack.c.bf16 %v499_v24, %v497_v23 }
  0xfe   :  { %446 = vmatmul.mubr.bf16.vlgmr.msra.gmra.mxu1 %v129_v25 }
 0x1be   :  { %v235_v33 = vpop.f32.mrf.mxu1 }
 0x1bf   :  { %v236_v34 = vadd.f32 %v382_v32, %v235_v33 }
 0x1c0   :  { %v447_v35 = vpop.f32.mrf.mxu1 }
 0x1c1   :  { %500 = vtanh.f32 %v236_v34 }
 0x1c2   :  { %v238_v36 = vpop.f32.mrf.mxu1 }
 0x1c3   :  { %v239_v37 = vadd.f32 %v382_v32, %v238_v36 }
 0x1c4   :  { %v448_v38 = vpop.f32.mrf.mxu1 }
 0x1c5   :  { %502 = vtanh.f32 %v239_v37 }
 0x1ce   :  { %v501_v39 = vpop.eup %500 }
 0x1d2   :  { %v503_v40 = vpop.eup %502 }
 0x1d3   :  { %v244_v41 = vpack.c.bf16 %v503_v40, %v501_v39 }
 0x1d5   :  { %466 = vmatmul.mubr.bf16.vlgmr.msra.gmra.mxu0 %v244_v41 }
 0x295   :  { %v350_v43 = vpop.f32.mrf.mxu0 }
 0x296   :  { %v351_v44 = vadd.f32 %v391_v42, %v350_v43 }
 0x297   :  { %v467_v45 = vpop.f32.mrf.mxu0 }
 0x298   :  { %358 = vst.msk [vmem:[#allocation7] sm:$0xff] %vm357_vm2, %v351_v44 }
 0x299   :  { %v353_v46 = vpop.f32.mrf.mxu0 }
 0x29a   :  { %v354_v47 = vadd.f32 %v391_v42, %v353_v46 }
 0x29b   :  { %v468_v48 = vpop.f32.mrf.mxu0 }
 0x29c   :  { %359 = vst.msk [vmem:[#allocation7 + $0x8] sm:$0xff] %vm357_vm2, %v354_v47 }
 0x29d   :  { %555 = shalt.err (!%p552_p0)
}
 0x29e   :  { %371 = dma.vmem_to_hbm [thread:$0]  %s366_s25, 256, %s722_s7, [#allocation4], %s571_s27, %s571_s27, %s572_s28  }
 0x29f   :  { %568 = dma.done.wait [#allocation4], 256  }
 0x2a0   :  { %569 = vsyncadd [#allocation4], 4294967040 }
 0x2a1   :  { %375 = vsyncpa [#allocation3], 1 }
 0x2a2   :  { %376 = vsyncpa [#allocation6], 1 }
 0x2a3   :  { %377 = vsyncpa [#allocation4], 1 }

// kernel: tpu_custom_call.1
= control target key start
LH: loop header
LB: loop body
LE: loop exit
PB: predicated region body
PF: predicated region fallthrough
CT: control target
= control target key end

     0   :  { %12 = vsyncpa [#allocation3], 0  ;;  %s715_s0 = inlined_call_operand.hbm [shape: f32[16,32], index: 0, kind: input, shape index: {}]   ;;  %s716_s1 = inlined_call_operand.hbm [shape: bf16[32,128], index: 1, kind: input, shape index: {}]   ;;  %s717_s2 = inlined_call_operand.vmem [shape: f32[1,128], index: 2, kind: input, shape index: {}]   ;;  %s718_s3 = inlined_call_operand.vmem [shape: bf16[128,128], index: 3, kind: input, shape index: {}]   ;;  %s719_s4 = inlined_call_operand.vmem [shape: f32[1,128], index: 4, kind: input, shape index: {}]   ;;  %s720_s5 = inlined_call_operand.vmem [shape: bf16[128,16], index: 5, kind: input, shape index: {}]   ;;  %s721_s6 = inlined_call_operand.vmem [shape: f32[1,16], index: 6, kind: input, shape index: {}]   ;;  %s722_s7 = inlined_call_operand.hbm [shape: f32[16,16], index: 7, kind: output, shape index: {}]  }
   0x1   :  { %13 = vsyncpa [#allocation6], 0 }
   0x2   :  { %14 = vsyncpa [#allocation4], 0  ;;  %s570_s24 = smov [#allocation2]  }
   0x3   :  { %s20_s25 = sshll.u32 %s570_s24, 4  ;;  %s21_s25 = int_to_ptr.vmem [resolvable:$true] %s20_s25 }
   0x4   :  { %s512_s26 = scalar_lea.vmem %s21_s25, 256  ;;  %p517_p1 = scmp.lt.s32.totalorder %s21_s25, %s21_s25 }
   0x5   :  { %p513_p0 = scmp.ne.s32.totalorder %s21_s25, %s512_s26  ;;  %p518_p2 = scmp.lt.s32.totalorder %s512_s26, %s512_s26 }
   0x7   :  { %p519_p3 = por %p518_p2, %p517_p1 }
   0x9   :  { %p520_p4 = pnand %p519_p3, %p513_p0 }
   0xb   :  { %523 = shalt.err (!%p520_p4)
}
   0xc   :  { %s571_s27 = smov 128   ;;  %s572_s28 = smov 8  }
   0xd   :  { %26 = dma.hbm_to_vmem [thread:$0]  %s715_s0, 256, %s21_s25, [#allocation3], %s571_s27, %s571_s27, %s572_s28  }
   0xe   :  { %s573_s8 = smov [#allocation5]  }
   0xf   :  { %s32_s9 = sshll.u32 %s573_s8, 4  ;;  %s33_s9 = int_to_ptr.vmem [resolvable:$true] %s32_s9 }
  0x10   :  { %s532_s10 = scalar_lea.vmem %s33_s9, 256  ;;  %p537_p6 = scmp.lt.s32.totalorder %s33_s9, %s33_s9 }
  0x11   :  { %p533_p5 = scmp.ne.s32.totalorder %s33_s9, %s532_s10  ;;  %p538_p7 = scmp.lt.s32.totalorder %s532_s10, %s532_s10 }
  0x13   :  { %p539_p8 = por %p538_p7, %p537_p6 }
  0x15   :  { %p540_p9 = pnand %p539_p8, %p533_p5 }
  0x17   :  { %543 = shalt.err (!%p540_p9)
}
  0x18   :  { %s574_s11 = smov 64   ;;  %s575_s12 = smov 4  }
  0x19   :  { %38 = dma.hbm_to_vmem [thread:$0]  %s716_s1, 256, %s33_s9, [#allocation6], %s574_s11, %s574_s11, %s575_s12  }
  0x1a   :  { %564 = dma.done.wait [#allocation3], 256  }
  0x1b   :  { %565 = vsyncadd [#allocation3], 4294967040 }
  0x1c   :  { %566 = dma.done.wait [#allocation6], 256  }
  0x1d   :  { %567 = vsyncadd [#allocation6], 4294967040  ;;  %v576_v0 = vmov 0.0   ;;  %vm577_vm0 = vmmov 0   ;;  %v478_v1 = vld [vmem:[#allocation5 + $0x8] sm:$0xff]   ;;  %v479_v2 = vld [vmem:[#allocation5] sm:$0xff]  }
  0x1e   :  { %421 = vmatprep.subr.bf16.mxu0 %v576_v0  ;;  %425 = vmatprep.mubr.msk.bf16.mxu0 %vm577_vm0, %v576_v0  ;;  %v56_v3 = vld [vmem:[#allocation2] sm:$0xff]  ;;  %v57_v4 = vld [vmem:[#allocation2 + $0x8] sm:$0xff]  ;;  %v480_v5 = vld [vmem:[%s718_s3 + $0x38] sm:$0xff]   ;;  %vm82_vm1 = vcmask 261120   ;;  %vm357_vm2 = vcmask 130048  }
  0x1f   :  { %429 = vmatprep.subr.bf16.mxu1 %v576_v0  ;;  %445 = vmatprep.mubr.msk.bf16.mxu1 %vm577_vm0, %v576_v0  ;;  %v481_v6 = vld [vmem:[%s718_s3 + $0x30] sm:$0xff]   ;;  %v58_v7 = vpack.c.bf16 %v57_v4, %v56_v3  ;;  %v482_v8 = vld [vmem:[%s718_s3 + $0x28] sm:$0xff]   ;;  %v483_v9 = vld [vmem:[%s718_s3 + $0x20] sm:$0xff]  }
  0x20   :  { %422 = vmatpush3.bf16.msra.mxu0 %v478_v1  ;;  %430 = vmatpush3.bf16.msra.mxu1 %v480_v5  ;;  %v484_v10 = vld [vmem:[%s718_s3 + $0x18] sm:$0xff]   ;;  %v485_v11 = vld [vmem:[%s718_s3 + $0x10] sm:$0xff]   ;;  %v486_v12 = vld [vmem:[%s718_s3 + $0x8] sm:$0xff]  }
  0x21   :  { %423 = vmatprep.subr.bf16.mxu0 %v576_v0  ;;  %431 = vmatprep.subr.bf16.mxu1 %v576_v0  ;;  %v487_v13 = vld [vmem:[%s718_s3] sm:$0xff]   ;;  %v488_v14 = vld [vmem:[%s720_s5 + $0x38] sm:$0xff]   ;;  %v489_v15 = vld [vmem:[%s720_s5 + $0x30] sm:$0xff]  }
  0x22   :  { %v378_v16 = vld [vmem:[%s717_s2] ss:$0 sm:$0xff]  ;;  %v490_v26 = vld [vmem:[%s720_s5 + $0x28] sm:$0xff]   ;;  %v492_v28 = vld [vmem:[%s720_s5 + $0x18] sm:$0xff]  }
  0x23   :  { %v491_v27 = vld [vmem:[%s720_s5 + $0x20] sm:$0xff]   ;;  %v493_v29 = vld [vmem:[%s720_s5 + $0x10] sm:$0xff]   ;;  %v494_v30 = vld [vmem:[%s720_s5 + $0x8] sm:$0xff]  }
  0x24   :  { %424 = vmatpush3.bf16.msra.mxu0 %v479_v2  ;;  %432 = vmatpush3.bf16.msra.mxu1 %v481_v6  ;;  %v495_v31 = vld [vmem:[%s720_s5] sm:$0xff]  }
  0x25   :  { %449 = vmatprep.subr.bf16.mxu0 %v576_v0  ;;  %433 = vmatprep.subr.bf16.mxu1 %v576_v0  ;;  %v382_v32 = vld [vmem:[%s719_s4] ss:$0 sm:$0xff]  ;;  %s578_s4 = smov [#allocation7]  }
  0x26   :  { %v391_v42 = vld [vmem:[%s721_s6] ss:$0 sm:$0xff]  ;;  %s365_s25 = sshll.u32 %s578_s4, 4  ;;  %s366_s25 = int_to_ptr.vmem [resolvable:$true] %s365_s25 }
  0x27   :  { %426 = vmatmul.mubr.msk.bf16.vlgmr.msra.gmra.mxu0 %vm82_vm1, %v58_v7  ;;  %s544_s26 = scalar_lea.vmem %s366_s25, 256  ;;  %p549_p11 = scmp.lt.s32.totalorder %s366_s25, %s366_s25 }
  0x28   :  { %465 = vmatprep.mubr.msk.bf16.mxu0 %vm577_vm0, %v576_v0  ;;  %434 = vmatpush3.bf16.msra.mxu1 %v482_v8  ;;  %p545_p10 = scmp.ne.s32.totalorder %s366_s25, %s544_s26  ;;  %p550_p12 = scmp.lt.s32.totalorder %s544_s26, %s544_s26 }
  0x29   :  { %435 = vmatprep.subr.bf16.mxu1 %v576_v0  ;;  %450 = vmatpush3.bf16.msra.mxu0 %v488_v14 }
  0x2a   :  { %451 = vmatprep.subr.bf16.mxu0 %v576_v0  ;;  %p551_p13 = por %p550_p12, %p549_p11 }
  0x2c   :  { %436 = vmatpush3.bf16.msra.mxu1 %v483_v9  ;;  %p552_p0 = pnand %p551_p13, %p545_p10 }
  0x2d   :  { %437 = vmatprep.subr.bf16.mxu1 %v576_v0  ;;  %452 = vmatpush3.bf16.msra.mxu0 %v489_v15 }
  0x2e   :  { %453 = vmatprep.subr.bf16.mxu0 %v576_v0 }
  0x30   :  { %438 = vmatpush3.bf16.msra.mxu1 %v484_v10 }
  0x31   :  { %439 = vmatprep.subr.bf16.mxu1 %v576_v0  ;;  %454 = vmatpush3.bf16.msra.mxu0 %v490_v26 }
  0x32   :  { %455 = vmatprep.subr.bf16.mxu0 %v576_v0 }
  0x34   :  { %440 = vmatpush3.bf16.msra.mxu1 %v485_v11 }
  0x35   :  { %441 = vmatprep.subr.bf16.mxu1 %v576_v0  ;;  %456 = vmatpush3.bf16.msra.mxu0 %v491_v27 }
  0x36   :  { %457 = vmatprep.subr.bf16.mxu0 %v576_v0 }
  0x38   :  { %442 = vmatpush3.bf16.msra.mxu1 %v486_v12 }
  0x39   :  { %443 = vmatprep.subr.bf16.mxu1 %v576_v0  ;;  %458 = vmatpush3.bf16.msra.mxu0 %v492_v28 }
  0x3a   :  { %459 = vmatprep.subr.bf16.mxu0 %v576_v0 }
  0x3c   :  { %444 = vmatpush3.bf16.msra.mxu1 %v487_v13 }
  0x3d   :  { %460 = vmatpush3.bf16.msra.mxu0 %v493_v29 }
  0x3e   :  { %461 = vmatprep.subr.bf16.mxu0 %v576_v0 }
  0x41   :  { %462 = vmatpush3.bf16.msra.mxu0 %v494_v30 }
  0x42   :  { %463 = vmatprep.subr.bf16.mxu0 %v576_v0 }
  0x45   :  { %464 = vmatpush3.bf16.msra.mxu0 %v495_v31 }
  0xe7   :  { %v120_v17 = vpop.f32.mrf.mxu0 }
  0xe8   :  { %v121_v18 = vadd.f32 %v378_v16, %v120_v17 }
  0xe9   :  { %v427_v19 = vpop.f32.mrf.mxu0 }
  0xea   :  { %496 = vtanh.f32 %v121_v18 }
  0xeb   :  { %v123_v20 = vpop.f32.mrf.mxu0 }
  0xec   :  { %v124_v21 = vadd.f32 %v378_v16, %v123_v20 }
  0xed   :  { %v428_v22 = vpop.f32.mrf.mxu0 }
  0xee   :  { %498 = vtanh.f32 %v124_v21 }
  0xf7   :  { %v497_v23 = vpop.eup %496 }
  0xfb   :  { %v499_v24 = vpop.eup %498 }
  0xfc   :  { %v129_v25 = vpack.c.bf16 %v499_v24, %v497_v23 }
  0xfe   :  { %446 = vmatmul.mubr.bf16.vlgmr.msra.gmra.mxu1 %v129_v25 }
 0x1be   :  { %v235_v33 = vpop.f32.mrf.mxu1 }
 0x1bf   :  { %v236_v34 = vadd.f32 %v382_v32, %v235_v33 }
 0x1c0   :  { %v447_v35 = vpop.f32.mrf.mxu1 }
 0x1c1   :  { %500 = vtanh.f32 %v236_v34 }
 0x1c2   :  { %v238_v36 = vpop.f32.mrf.mxu1 }
 0x1c3   :  { %v239_v37 = vadd.f32 %v382_v32, %v238_v36 }
 0x1c4   :  { %v448_v38 = vpop.f32.mrf.mxu1 }
 0x1c5   :  { %502 = vtanh.f32 %v239_v37 }
 0x1ce   :  { %v501_v39 = vpop.eup %500 }
 0x1d2   :  { %v503_v40 = vpop.eup %502 }
 0x1d3   :  { %v244_v41 = vpack.c.bf16 %v503_v40, %v501_v39 }
 0x1d5   :  { %466 = vmatmul.mubr.bf16.vlgmr.msra.gmra.mxu0 %v244_v41 }
 0x295   :  { %v350_v43 = vpop.f32.mrf.mxu0 }
 0x296   :  { %v351_v44 = vadd.f32 %v391_v42, %v350_v43 }
 0x297   :  { %v467_v45 = vpop.f32.mrf.mxu0 }
 0x298   :  { %358 = vst.msk [vmem:[#allocation7] sm:$0xff] %vm357_vm2, %v351_v44 }
 0x299   :  { %v353_v46 = vpop.f32.mrf.mxu0 }
 0x29a   :  { %v354_v47 = vadd.f32 %v391_v42, %v353_v46 }
 0x29b   :  { %v468_v48 = vpop.f32.mrf.mxu0 }
 0x29c   :  { %359 = vst.msk [vmem:[#allocation7 + $0x8] sm:$0xff] %vm357_vm2, %v354_v47 }
 0x29d   :  { %555 = shalt.err (!%p552_p0)
}
 0x29e   :  { %371 = dma.vmem_to_hbm [thread:$0]  %s366_s25, 256, %s722_s7, [#allocation4], %s571_s27, %s571_s27, %s572_s28  }
 0x29f   :  { %568 = dma.done.wait [#allocation4], 256  }
 0x2a0   :  { %569 = vsyncadd [#allocation4], 4294967040 }
 0x2a1   :  { %375 = vsyncpa [#allocation3], 1 }
 0x2a2   :  { %376 = vsyncpa [#allocation6], 1 }
 0x2a3   :  { %377 = vsyncpa [#allocation4], 1 }

</bundles_post_ra>
